<compile_context>
chip_gen: v7x
topology: tpu7x:2x2x1
jax: 0.10.0
libtpu: 0.0.40
codegen_flags: <defaults>
</compile_context>

<pallas_src>
import jax
import jax.numpy as jnp
from jax.experimental import pallas as pl
from jax.experimental.pallas import tpu as pltpu


def _make_kernel(dx: float, L: int):
    inv_dx2 = 1.0 / (dx * dx)   # laplacian kernel [1, -2, 1] / dx^2
    inv_2dx = 0.5 / dx          # gradient  kernel [-1/2, 0, 1/2] / dx

    def kernel(d_ref, u_ref, o_ref):
        # d_ref : SMEM (3,)  -> D_1, D_2, D_3
        # u_ref : VMEM (TM, L) row tile; block always holds the full row of
        #         length L so the circular boundary via roll is correct.
        # o_ref : VMEM (TM, L)
        d1 = d_ref[0]
        d2 = d_ref[1]
        d3 = d_ref[2]
        # Fold stencil + linear combo into 3 coefficients (scalar slots, free):
        #   out = D1*(l - 2u + r)/dx^2 + D2*(r - l)/(2dx) + D3*u
        #       = a*l + b*r + c*u
        a = d1 * inv_dx2 - d2 * inv_2dx
        b = d1 * inv_dx2 + d2 * inv_2dx
        c = d3 - 2.0 * d1 * inv_dx2

        u = u_ref[...]
        left = pltpu.roll(u, 1, axis=1)       # u[i-1]  (circular)
        right = pltpu.roll(u, L - 1, axis=1)  # u[i+1]  (circular)
        o_ref[...] = a * left + b * right + c * u

    return kernel


def _pick_row_tile(rows: int, L: int, itemsize: int,
                   per_buffer_bytes: int = 4 << 20) -> int:
    """Largest row tile such that one (TM, L) buffer stays <= per_buffer_bytes.

    Input + output are each double-buffered, so steady-state VMEM use is ~4x a
    single buffer; 4 MiB/buffer keeps us inside every generation's default
    scoped VMEM (16 MiB on v5e, 32 MiB on v6e/v7x, well under v7x's 64 MiB).
    """
    max_rows = max(8, per_buffer_bytes // max(1, L * itemsize))
    if rows <= max_rows:
        return rows                       # single block: full-dim block is exempt
    return max(8, (max_rows // 8) * 8)    # sublane-aligned (multiple of 8) tile


def parametric_part_forward(state, d_params, dx):
    """state: (N, C, L) float32 with C == 1 (conv1d weight is (1, 1, 3))."""
    N, C, L = state.shape
    rows = N * C
    u2d = state.reshape(rows, L)
    # TODO(synk): if production L is not a multiple of 128, pad the lane axis
    # (carrying the circular wrap into the pad) so stores stay lane-dense.

    tm = _pick_row_tile(rows, L, u2d.dtype.itemsize)
    grid = (pl.cdiv(rows, tm),)

    out = pl.pallas_call(
        _make_kernel(float(dx), L),
        out_shape=jax.ShapeDtypeStruct((rows, L), state.dtype),
        grid=grid,
        in_specs=[
            pl.BlockSpec(memory_space=pltpu.MemorySpace.SMEM),  # D_1, D_2, D_3
            pl.BlockSpec((tm, L), lambda i: (i, 0)),            # U row tile (full L)
        ],
        out_specs=pl.BlockSpec((tm, L), lambda i: (i, 0)),
        compiler_params=pltpu.CompilerParams(
            # row tiles are independent -> shard across v7x's two TensorCores
            dimension_semantics=("parallel",),
            vmem_limit_bytes=48 << 20,
        ),
        cost_estimate=pl.CostEstimate(
            flops=5 * rows * L,
            transcendentals=0,
            bytes_accessed=2 * rows * L * u2d.dtype.itemsize,
        ),
    )(d_params, u2d)
    return out.reshape(N, C, L)


def _reference(state, d_params, dx):
    # Pure-JAX reference mirroring the PyTorch forward.
    left = jnp.roll(state, 1, axis=-1)    # u[i-1]
    right = jnp.roll(state, -1, axis=-1)  # u[i+1]
    delta_u = (left - 2.0 * state + right) / (dx * dx)
    grad_u = (right - left) / (2.0 * dx)
    return d_params[0] * delta_u + d_params[1] * grad_u + d_params[2] * state


if __name__ == "__main__":
    key = jax.random.PRNGKey(0)
    dx = 0.1

    # Module shapes: state is (batch, 1, L) since conv1d weight is (1, 1, 3).
    N, C, L = 2, 1, 128
    state = jax.random.normal(key, (N, C, L), dtype=jnp.float32)

    # Module __init__ sets D_1 = D_2 = D_3 = 0.0; use deterministic nonzero
    # values so the stencil path is actually exercised.
    d_params = jnp.array([0.05, -0.10, 0.20], dtype=jnp.float32)

    out = parametric_part_forward(state, d_params, dx)
    out = jax.block_until_ready(out)

    ref = _reference(state, d_params, dx)
    assert out.shape == (N, C, L)
    assert jnp.allclose(out, ref, atol=1e-5, rtol=1e-5), "mismatch vs reference"

    print("KERNEL_OK")
</pallas_src>

<mosaic_0001>
module attributes {stable_mosaic.version = 11 : i64} {
  func.func @kernel(%arg0: i32, %arg1: memref<3xf32, #tpu.memory_space<smem>>, %arg2: memref<2x128xf32, #tpu.memory_space<vmem>>, %arg3: memref<2x128xf32, #tpu.memory_space<vmem>>) attributes {dimension_semantics = [#tpu.dimension_semantics<parallel>], iteration_bounds = array<i64: 1>, scalar_prefetch = 0 : i64, scratch_operands = 0 : i64, tpu.core_type = #tpu.core_type<tc>, window_params = [{transform_indices = @transform_0, window_bounds = array<i64: 3>}, {transform_indices = @transform_1, window_bounds = array<i64: 2, 128>}, {transform_indices = @transform_2, window_bounds = array<i64: 2, 128>}]} {
    %c0 = arith.constant 0 : index
    %0 = memref.load %arg1[%c0] : memref<3xf32, #tpu.memory_space<smem>>
    %c1 = arith.constant 1 : index
    %1 = memref.load %arg1[%c1] : memref<3xf32, #tpu.memory_space<smem>>
    %c2 = arith.constant 2 : index
    %2 = memref.load %arg1[%c2] : memref<3xf32, #tpu.memory_space<smem>>
    %cst = arith.constant 1.000000e+02 : f32
    %3 = arith.mulf %0, %cst : f32
    %cst_0 = arith.constant 5.000000e+00 : f32
    %4 = arith.mulf %1, %cst_0 : f32
    %5 = arith.subf %3, %4 : f32
    %cst_1 = arith.constant 1.000000e+02 : f32
    %6 = arith.mulf %0, %cst_1 : f32
    %cst_2 = arith.constant 5.000000e+00 : f32
    %7 = arith.mulf %1, %cst_2 : f32
    %8 = arith.addf %6, %7 : f32
    %cst_3 = arith.constant 2.000000e+00 : f32
    %9 = arith.mulf %cst_3, %0 : f32
    %cst_4 = arith.constant 1.000000e+02 : f32
    %10 = arith.mulf %9, %cst_4 : f32
    %11 = arith.subf %2, %10 : f32
    %c0_5 = arith.constant 0 : index
    %c0_6 = arith.constant 0 : index
    %12 = vector.load %arg2[%c0_5, %c0_6] : memref<2x128xf32, #tpu.memory_space<vmem>>, vector<2x128xf32>
    %c1_i32 = arith.constant 1 : i32
    %13 = tpu.dynamic_rotate %12 by %c1_i32 dim 1 : vector<2x128xf32>, i32 -> vector<2x128xf32>
    %c127_i32 = arith.constant 127 : i32
    %14 = tpu.dynamic_rotate %12 by %c127_i32 dim 1 : vector<2x128xf32>, i32 -> vector<2x128xf32>
    %15 = vector.broadcast %5 : f32 to vector<2x128xf32>
    %16 = arith.mulf %15, %13 : vector<2x128xf32>
    %17 = vector.broadcast %8 : f32 to vector<2x128xf32>
    %18 = arith.mulf %17, %14 : vector<2x128xf32>
    %19 = arith.addf %16, %18 : vector<2x128xf32>
    %20 = vector.broadcast %11 : f32 to vector<2x128xf32>
    %21 = arith.mulf %20, %12 : vector<2x128xf32>
    %22 = arith.addf %19, %21 : vector<2x128xf32>
    %c0_7 = arith.constant 0 : index
    %c0_8 = arith.constant 0 : index
    %23 = vector.load %arg3[%c0_7, %c0_8] : memref<2x128xf32, #tpu.memory_space<vmem>>, vector<2x128xf32>
    tpu.vector_store %arg3[%c0_7, %c0_8], %22 {strides = array<i32>} : memref<2x128xf32, #tpu.memory_space<vmem>>, vector<2x128xf32>,
    return
  }
  func.func @transform_0(%arg0: i32) -> i32 {
    %c0_i32 = arith.constant 0 : i32
    %c0_i32_0 = arith.constant 0 : i32
    return %c0_i32 : i32
  }
  func.func @transform_1(%arg0: i32) -> (i32, i32) {
    %c0_i32 = arith.constant 0 : i32
    %c0_i32_0 = arith.constant 0 : i32
    return %arg0, %c0_i32 : i32, i32
  }
  func.func @transform_2(%arg0: i32) -> (i32, i32) {
    %c0_i32 = arith.constant 0 : i32
    %c0_i32_0 = arith.constant 0 : i32
    return %arg0, %c0_i32 : i32, i32
  }
}

</mosaic_0001>

<bundles_post_ra>
// kernel: tpu_custom_call.1
= control target key start
LH: loop header
LB: loop body
LE: loop exit
PB: predicated region body
PF: predicated region fallthrough
CT: control target
= control target key end

     0   :  { %7 = vsyncpa [#allocation4], 0  ;;  %s150_s0 = inlined_call_operand.hbm [shape: f32[3], index: 0, kind: input, shape index: {}]   ;;  %s151_s1 = inlined_call_operand.vmem [shape: f32[2,128], index: 1, kind: input, shape index: {}]   ;;  %s152_s2 = inlined_call_operand.hbm [shape: f32[2,128], index: 2, kind: output, shape index: {}]  }
   0x1   :  { %8 = vsyncpa [#allocation3], 0  ;;  %s68_s11 = scalar_lea.hbm %s150_s0, 16 }
   0x2   :  { %p69_p0 = scmp.ne.s32.totalorder %s150_s0, %s68_s11  ;;  %p72_p1 = scmp.lt.u32.totalorder %s68_s11, %s150_s0 }
   0x4   :  { %p74_p2 = pnand %p72_p1, %p69_p0 }
   0x6   :  { %77 = shalt.err (!%p74_p2)
}
   0x7   :  { %s104_s16 = smov [#allocation2]  }
   0x8   :  { %16 = dma.hbm_to_smem %s150_s0, 16, %s104_s16, [#allocation4]  }
   0x9   :  { %100 = dma.done.wait [#allocation4], 16  }
   0xa   :  { %101 = vsyncadd [#allocation4], 4294967280 }
   0xb   :  { %22 = sfence }
   0xc   :  { %v33_v0 = vld [vmem:[%s151_s1] sm:$0x3]  ;;  %s105_s21 = smov 1   ;;  %s106_s22 = smov 127  }
   0xd   :  { %34 = vrot.lane.b32.xlu0 %v33_v0, %s105_s21  ;;  %s23_s23 = sld [smem:[#allocation2]]  ;;  %s62_s24 = sld [smem:[#allocation2 + $0x1]] }
   0xe   :  { %s63_s25 = sld [smem:[#allocation2 + $0x2]]  ;;  %s107_s1 = smov [#allocation5]  }
   0xf   :  { %s53_s4 = sshll.u32 %s107_s1, 4  ;;  %s54_s4 = int_to_ptr.vmem [resolvable:$true] %s53_s4 }
  0x10   :  { %s78_s5 = scalar_lea.vmem %s54_s4, 32  ;;  %p83_p4 = scmp.lt.s32.totalorder %s54_s4, %s54_s4 }
  0x11   :  { %36 = vrot.lane.b32.xlu0 %v33_v0, %s106_s22  ;;  %p79_p3 = scmp.ne.s32.totalorder %s54_s4, %s78_s5  ;;  %p84_p5 = scmp.lt.s32.totalorder %s78_s5, %s78_s5 }
  0x13   :  { %s30_s26 = smul.f32 2.0, %s23_s23  ;;  %p85_p6 = por %p84_p5, %p83_p4 }
  0x14   :  { %s26_s27 = smul.f32 100.0, %s23_s23 }
  0x15   :  { %s27_s28 = smul.f32 5.0, %s62_s24  ;;  %p86_p7 = pnand %p85_p6, %p79_p3 }
  0x16   :  { %s31_s29 = smul.f32 100.0, %s30_s26 }
  0x17   :  { %s28_s30 = ssub.f32 %s26_s27, %s27_s28 }
  0x18   :  { %s29_s0 = sadd.f32 %s27_s28, %s26_s27 }
  0x19   :  { %s32_s3 = ssub.f32 %s63_s25, %s31_s29  ;;  %v38_v2 = vstv %s28_s30 }
  0x1a   :  { %v40_v3 = vstv %s29_s0 }
  0x1b   :  { %v43_v4 = vstv %s32_s3 }
  0x1c   :  { %v44_v8 = vmul.f32 %v43_v4, %v33_v0 }
  0x7f   :  { %v35_v1 = vpop.permute.xlu0 %34 }
  0x80   :  { %v39_v6 = vmul.f32 %v38_v2, %v35_v1 }
  0x83   :  { %v37_v5 = vpop.permute.xlu0 %36 }
  0x84   :  { %v41_v7 = vmul.f32 %v40_v3, %v37_v5 }
  0x86   :  { %v42_v9 = vadd.f32 %v41_v7, %v39_v6 }
  0x88   :  { %v45_v10 = vadd.f32 %v44_v8, %v42_v9 }
  0x8a   :  { %46 = vst [vmem:[#allocation5] sm:$0x3] %v45_v10 }
  0x8b   :  { %89 = shalt.err (!%p86_p7)
}
  0x8c   :  { %s90_s8 = scalar_lea.hbm %s152_s2, 32 }
  0x8d   :  { %p91_p8 = scmp.ne.s32.totalorder %s152_s2, %s90_s8  ;;  %p94_p9 = scmp.lt.u32.totalorder %s90_s8, %s152_s2 }
  0x8f   :  { %p96_p10 = pnand %p94_p9, %p91_p8 }
  0x91   :  { %99 = shalt.err (!%p96_p10)
}
  0x92   :  { %56 = dma.vmem_to_hbm [thread:$0]  %s54_s4, 32, %s152_s2, [#allocation3]  }
  0x93   :  { %102 = dma.done.wait [#allocation3], 32  }
  0x94   :  { %103 = vsyncadd [#allocation3], 4294967264 }
  0x95   :  { %60 = vsyncpa [#allocation3], 1 }
  0x96   :  { %61 = vsyncpa [#allocation4], 1 }

</bundles_post_ra>
